<compile_context>
chip_gen: v7x
topology: tpu7x:2x2x1
jax: 0.10.0
libtpu: 0.0.40
codegen_flags: <defaults>
</compile_context>

<pallas_src>
import jax
import jax.numpy as jnp
import numpy as np
from jax.experimental import pallas as pl
from jax.experimental.pallas import tpu as pltpu

BN_EPS = 1e-5

# 3x3 tap offsets, (kh, kw)-major: tap index t = (dh + 1) * 3 + (dw + 1).
_TAPS = tuple((dh, dw) for dh in (-1, 0, 1) for dw in (-1, 0, 1))


# -----------------------------------------------------------------------------
# Wrapper: BN folding, weight reshaping, mask precompute, pallas_call
# -----------------------------------------------------------------------------
def basic_block_forward(params, x):
    """x: [B, C, H, W] (NCHW, matching PyTorch). stride=1, downsample=None."""
    B, Cin, H, W = x.shape
    w1, w2 = params["w1"], params["w2"]
    Cout = w1.shape[0]
    assert Cout == Cin, "identity residual requires inplanes == planes"
    HW = H * W

    # ---- Fold eval-mode BatchNorm into per-channel (scale, shift); scale goes
    # straight into the conv weight rows, shift becomes an in-kernel bias.
    def fold(g, b, m, v):
        s = g * jax.lax.rsqrt(v + BN_EPS)
        return s, b - m * s

    s1, t1 = fold(params["g1"], params["be1"], params["m1"], params["v1"])
    s2, t2 = fold(params["g2"], params["be2"], params["m2"], params["v2"])

    # OIHW -> [Cout, 9*Cin] with columns ordered (kh, kw)-major then input
    # channel, matching the kernel's im2col row order.  BN scale folded into
    # the rows; cast to bf16 for the MXU (f32 accumulation stays in-kernel).
    def to_mat(w, scale):
        o, i, kh, kw = w.shape
        m = jnp.transpose(w, (0, 2, 3, 1)).reshape(o, kh * kw * i)
        return (m * scale[:, None]).astype(jnp.bfloat16)

    w1m = to_mat(w1, s1)                                    # [Cout, 9*Cin]  bf16
    w2m = to_mat(w2, s2)                                    # [Cout, 9*Cout] bf16
    bias = jnp.stack([t1, t2], axis=1).astype(jnp.float32)  # [Cout, 2]      f32

    # ---- Precomputed 0/1 boundary masks for the 9 shifted windows, [9, HW].
    # (Static numpy -> compile-time constant; zeroes the pad=1 halo taps.)
    hh, ww = np.meshgrid(np.arange(H), np.arange(W), indexing="ij")
    mask_rows = []
    for dh, dw in _TAPS:
        valid = ((hh + dh >= 0) & (hh + dh < H) &
                 (ww + dw >= 0) & (ww + dw < W))
        mask_rows.append(valid.reshape(-1))
    tap_masks = jnp.asarray(np.stack(mask_rows, axis=0).astype(np.float32))

    # ---- Free reshape of contiguous NCHW: channels on sublanes, spatial lanes.
    x_flat = x.reshape(B, Cin, HW)                          # [B, Cin, HW]

    def kernel(x_ref, w1_ref, w2_ref, bias_ref, mask_ref, o_ref):
        xv = x_ref[...]                                     # [Cin, HW] f32
        masks = mask_ref[...]                               # [9, HW]   f32

        def im2col_bf16(a):
            # a: [C, HW] f32 -> [9*C, HW] bf16, rows ordered (kh, kw)-major then
            # channel.  Shifted windows via lane rotation (XLU) + boundary mask;
            # wrapped-around lanes are always zeroed by the mask.
            rows = []
            for t, (dh, dw) in enumerate(_TAPS):
                d = dh * W + dw
                if d == 0:
                    rows.append(a)
                else:
                    sh = pltpu.roll(a, shift=(-d) % HW, axis=1)
                    rows.append(sh * masks[t:t + 1, :])
            return jnp.concatenate(rows, axis=0).astype(jnp.bfloat16)

        # conv1 (3x3, pad=1, no bias) + folded bn1 + relu:
        #   [Cout, 9*Cin] @ [9*Cin, HW]  (bf16 x bf16 -> f32 accumulate)
        h1 = jnp.dot(w1_ref[...], im2col_bf16(xv),
                     preferred_element_type=jnp.float32)    # [Cout, HW]
        h1 = jnp.maximum(h1 + bias_ref[:, 0:1], 0.0)

        # conv2 (3x3, pad=1, no bias) + folded bn2
        h2 = jnp.dot(w2_ref[...], im2col_bf16(h1),
                     preferred_element_type=jnp.float32)    # [Cout, HW]
        h2 = h2 + bias_ref[:, 1:2]

        # identity residual + relu; lane-dense full-width store (no transpose).
        o_ref[...] = jnp.maximum(h2 + xv, 0.0)

    # NOTE: at production resolutions (e.g. 64x2048 range images) re-tile the
    # grid along H with a 1-row halo (strip heights whose lane extent is a
    # multiple of 256 on v6e/v7x, 128 on v5e), raise vmem_limit_bytes, and mark
    # the strip axis "parallel" so both v7x TensorCores stay busy even at B=1.
    # At these toy sizes one full plane per grid step fits VMEM trivially.
    out = pl.pallas_call(
        kernel,
        out_shape=jax.ShapeDtypeStruct((B, Cout, HW), jnp.float32),
        grid=(B,),
        in_specs=[
            pl.BlockSpec((None, Cin, HW), lambda b: (b, 0, 0)),
            pl.BlockSpec((Cout, 9 * Cin), lambda b: (0, 0)),
            pl.BlockSpec((Cout, 9 * Cout), lambda b: (0, 0)),
            pl.BlockSpec((Cout, 2), lambda b: (0, 0)),
            pl.BlockSpec((9, HW), lambda b: (0, 0)),
        ],
        out_specs=pl.BlockSpec((None, Cout, HW), lambda b: (b, 0, 0)),
        compiler_params=pltpu.CompilerParams(
            dimension_semantics=("parallel",)),
    )(x_flat, w1m, w2m, bias, tap_masks)

    return out.reshape(B, Cout, H, W)       # free, layout-preserving reshape


# -----------------------------------------------------------------------------
# Pure-JAX reference (for correctness check)
# -----------------------------------------------------------------------------
def basic_block_reference(params, x):
    def conv3x3(xx, w):
        return jax.lax.conv_general_dilated(
            xx, w, window_strides=(1, 1), padding=((1, 1), (1, 1)),
            dimension_numbers=("NCHW", "OIHW", "NCHW"))

    def bn(xx, g, b, m, v):
        return ((xx - m[None, :, None, None])
                * jax.lax.rsqrt(v[None, :, None, None] + BN_EPS)
                * g[None, :, None, None] + b[None, :, None, None])

    p = params
    out = conv3x3(x, p["w1"])
    out = bn(out, p["g1"], p["be1"], p["m1"], p["v1"])
    out = jnp.maximum(out, 0.0)
    out = conv3x3(out, p["w2"])
    out = bn(out, p["g2"], p["be2"], p["m2"], p["v2"])
    out = out + x                  # identity residual (stride=1, no downsample)
    return jnp.maximum(out, 0.0)


# -----------------------------------------------------------------------------
# Deterministic parameter init (PyTorch OIHW conv layout; BN per-channel vectors)
# -----------------------------------------------------------------------------
def init_params(key, inplanes, planes):
    ks = iter(jax.random.split(key, 12))

    def conv_init(cin, cout):
        return jax.random.normal(next(ks), (cout, cin, 3, 3), jnp.float32) * 0.1

    def bn_init(c):
        g = jax.random.uniform(next(ks), (c,), jnp.float32, 0.5, 1.5)
        b = jax.random.normal(next(ks), (c,), jnp.float32) * 0.1
        m = jax.random.normal(next(ks), (c,), jnp.float32) * 0.1
        v = jax.random.uniform(next(ks), (c,), jnp.float32, 0.5, 1.5)
        return g, b, m, v

    p = {}
    p["w1"] = conv_init(inplanes, planes)
    p["g1"], p["be1"], p["m1"], p["v1"] = bn_init(planes)
    p["w2"] = conv_init(planes, planes)
    p["g2"], p["be2"], p["m2"], p["v2"] = bn_init(planes)
    return p


if __name__ == "__main__":
    key = jax.random.PRNGKey(0)
    k_x, k_params = jax.random.split(key)

    # Small shapes consistent with BasicBlock(inplanes=planes, stride=1):
    #   x: [B, C, H, W] = [2, 8, 16, 16]   (H*W = 256 -> lane-dense spatial axis)
    B, C, H, W = 2, 8, 16, 16
    x = jax.random.normal(k_x, (B, C, H, W), jnp.float32)
    params = init_params(k_params, C, C)

    out = jax.jit(basic_block_forward)(params, x)
    out = jax.block_until_ready(out)

    ref = jax.block_until_ready(basic_block_reference(params, x))
    # bf16 MXU inputs (with f32 accumulation) -> looser tolerance than pure f32.
    np.testing.assert_allclose(np.asarray(out), np.asarray(ref),
                               rtol=5e-2, atol=5e-2)
    assert out.shape == (B, C, H, W)

    print("KERNEL_OK")
</pallas_src>

<mosaic_0001>
module attributes {stable_mosaic.version = 11 : i64} {
  func.func @kernel(%arg0: i32, %arg1: memref<1x8x256xf32, #tpu.memory_space<vmem>>, %arg2: memref<8x72xbf16, #tpu.memory_space<vmem>>, %arg3: memref<8x72xbf16, #tpu.memory_space<vmem>>, %arg4: memref<8x2xf32, #tpu.memory_space<vmem>>, %arg5: memref<9x256xf32, #tpu.memory_space<vmem>>, %arg6: memref<1x8x256xf32, #tpu.memory_space<vmem>>) attributes {dimension_semantics = [#tpu.dimension_semantics<parallel>], iteration_bounds = array<i64: 2>, scalar_prefetch = 0 : i64, scratch_operands = 0 : i64, tpu.core_type = #tpu.core_type<tc>, window_params = [{transform_indices = @transform_0, window_bounds = array<i64: 1, 8, 256>}, {pipeline_mode = #tpu.pipeline_mode<synchronous>, transform_indices = @transform_1, window_bounds = array<i64: 8, 72>}, {pipeline_mode = #tpu.pipeline_mode<synchronous>, transform_indices = @transform_2, window_bounds = array<i64: 8, 72>}, {pipeline_mode = #tpu.pipeline_mode<synchronous>, transform_indices = @transform_3, window_bounds = array<i64: 8, 2>}, {pipeline_mode = #tpu.pipeline_mode<synchronous>, transform_indices = @transform_4, window_bounds = array<i64: 9, 256>}, {transform_indices = @transform_5, window_bounds = array<i64: 1, 8, 256>}]} {
    %c0 = arith.constant 0 : index
    %c0_0 = arith.constant 0 : index
    %c0_1 = arith.constant 0 : index
    %0 = vector.load %arg1[%c0, %c0_0, %c0_1] : memref<1x8x256xf32, #tpu.memory_space<vmem>>, vector<1x8x256xf32>
    %1 = vector.shape_cast %0 : vector<1x8x256xf32> to vector<8x256xf32>
    %c0_2 = arith.constant 0 : index
    %c0_3 = arith.constant 0 : index
    %2 = vector.load %arg5[%c0_2, %c0_3] : memref<9x256xf32, #tpu.memory_space<vmem>>, vector<9x256xf32>
    %c0_4 = arith.constant 0 : index
    %c0_5 = arith.constant 0 : index
    %3 = vector.load %arg2[%c0_4, %c0_5] : memref<8x72xbf16, #tpu.memory_space<vmem>>, vector<8x72xbf16>
    %c17_i32 = arith.constant 17 : i32
    %4 = tpu.dynamic_rotate %1 by %c17_i32 dim 1 : vector<8x256xf32>, i32 -> vector<8x256xf32>
    %5 = vector.extract_strided_slice %2 {offsets = [0, 0], sizes = [1, 256], strides = [1, 1]} : vector<9x256xf32> to vector<1x256xf32>
    %6 = vector.broadcast %5 : vector<1x256xf32> to vector<8x256xf32>
    %7 = arith.mulf %4, %6 : vector<8x256xf32>
    %c16_i32 = arith.constant 16 : i32
    %8 = tpu.dynamic_rotate %1 by %c16_i32 dim 1 : vector<8x256xf32>, i32 -> vector<8x256xf32>
    %9 = vector.extract_strided_slice %2 {offsets = [1, 0], sizes = [1, 256], strides = [1, 1]} : vector<9x256xf32> to vector<1x256xf32>
    %10 = vector.broadcast %9 : vector<1x256xf32> to vector<8x256xf32>
    %11 = arith.mulf %8, %10 : vector<8x256xf32>
    %c15_i32 = arith.constant 15 : i32
    %12 = tpu.dynamic_rotate %1 by %c15_i32 dim 1 : vector<8x256xf32>, i32 -> vector<8x256xf32>
    %13 = vector.extract_strided_slice %2 {offsets = [2, 0], sizes = [1, 256], strides = [1, 1]} : vector<9x256xf32> to vector<1x256xf32>
    %14 = vector.broadcast %13 : vector<1x256xf32> to vector<8x256xf32>
    %15 = arith.mulf %12, %14 : vector<8x256xf32>
    %c1_i32 = arith.constant 1 : i32
    %16 = tpu.dynamic_rotate %1 by %c1_i32 dim 1 : vector<8x256xf32>, i32 -> vector<8x256xf32>
    %17 = vector.extract_strided_slice %2 {offsets = [3, 0], sizes = [1, 256], strides = [1, 1]} : vector<9x256xf32> to vector<1x256xf32>
    %18 = vector.broadcast %17 : vector<1x256xf32> to vector<8x256xf32>
    %19 = arith.mulf %16, %18 : vector<8x256xf32>
    %c255_i32 = arith.constant 255 : i32
    %20 = tpu.dynamic_rotate %1 by %c255_i32 dim 1 : vector<8x256xf32>, i32 -> vector<8x256xf32>
    %21 = vector.extract_strided_slice %2 {offsets = [5, 0], sizes = [1, 256], strides = [1, 1]} : vector<9x256xf32> to vector<1x256xf32>
    %22 = vector.broadcast %21 : vector<1x256xf32> to vector<8x256xf32>
    %23 = arith.mulf %20, %22 : vector<8x256xf32>
    %c241_i32 = arith.constant 241 : i32
    %24 = tpu.dynamic_rotate %1 by %c241_i32 dim 1 : vector<8x256xf32>, i32 -> vector<8x256xf32>
    %25 = vector.extract_strided_slice %2 {offsets = [6, 0], sizes = [1, 256], strides = [1, 1]} : vector<9x256xf32> to vector<1x256xf32>
    %26 = vector.broadcast %25 : vector<1x256xf32> to vector<8x256xf32>
    %27 = arith.mulf %24, %26 : vector<8x256xf32>
    %c240_i32 = arith.constant 240 : i32
    %28 = tpu.dynamic_rotate %1 by %c240_i32 dim 1 : vector<8x256xf32>, i32 -> vector<8x256xf32>
    %29 = vector.extract_strided_slice %2 {offsets = [7, 0], sizes = [1, 256], strides = [1, 1]} : vector<9x256xf32> to vector<1x256xf32>
    %30 = vector.broadcast %29 : vector<1x256xf32> to vector<8x256xf32>
    %31 = arith.mulf %28, %30 : vector<8x256xf32>
    %c239_i32 = arith.constant 239 : i32
    %32 = tpu.dynamic_rotate %1 by %c239_i32 dim 1 : vector<8x256xf32>, i32 -> vector<8x256xf32>
    %33 = vector.extract_strided_slice %2 {offsets = [8, 0], sizes = [1, 256], strides = [1, 1]} : vector<9x256xf32> to vector<1x256xf32>
    %34 = vector.broadcast %33 : vector<1x256xf32> to vector<8x256xf32>
    %35 = arith.mulf %32, %34 : vector<8x256xf32>
    %36 = tpu.concatenate %7, %11, %15, %19, %1, %23, %27, %31, %35 in 0 : vector<8x256xf32>, vector<8x256xf32>, vector<8x256xf32>, vector<8x256xf32>, vector<8x256xf32>, vector<8x256xf32>, vector<8x256xf32>, vector<8x256xf32>, vector<8x256xf32> -> vector<72x256xf32>
    %37 = arith.truncf %36 : vector<72x256xf32> to vector<72x256xbf16>
    %cst = arith.constant dense<0.000000e+00> : vector<8x256xf32>
    %38 = tpu.matmul %3, %37, %cst {dimension_numbers = #tpu.dot_dimension_numbers<[1], [0], [0], [1], [0, 0, 1, 1], [], []>} : vector<8x72xbf16>, vector<72x256xbf16>, vector<8x256xf32> -> vector<8x256xf32>
    %c0_6 = arith.constant 0 : index
    %c0_7 = arith.constant 0 : index
    %39 = vector.load %arg4[%c0_6, %c0_7] : memref<8x2xf32, #tpu.memory_space<vmem>>, vector<8x1xf32>
    %40 = vector.broadcast %39 : vector<8x1xf32> to vector<8x256xf32>
    %41 = arith.addf %38, %40 : vector<8x256xf32>
    %cst_8 = arith.constant 0.000000e+00 : f32
    %42 = vector.broadcast %cst_8 : f32 to vector<8x256xf32>
    %43 = arith.maximumf %41, %42 : vector<8x256xf32>
    %c0_9 = arith.constant 0 : index
    %c0_10 = arith.constant 0 : index
    %44 = vector.load %arg3[%c0_9, %c0_10] : memref<8x72xbf16, #tpu.memory_space<vmem>>, vector<8x72xbf16>
    %c17_i32_11 = arith.constant 17 : i32
    %45 = tpu.dynamic_rotate %43 by %c17_i32_11 dim 1 : vector<8x256xf32>, i32 -> vector<8x256xf32>
    %46 = vector.extract_strided_slice %2 {offsets = [0, 0], sizes = [1, 256], strides = [1, 1]} : vector<9x256xf32> to vector<1x256xf32>
    %47 = vector.broadcast %46 : vector<1x256xf32> to vector<8x256xf32>
    %48 = arith.mulf %45, %47 : vector<8x256xf32>
    %c16_i32_12 = arith.constant 16 : i32
    %49 = tpu.dynamic_rotate %43 by %c16_i32_12 dim 1 : vector<8x256xf32>, i32 -> vector<8x256xf32>
    %50 = vector.extract_strided_slice %2 {offsets = [1, 0], sizes = [1, 256], strides = [1, 1]} : vector<9x256xf32> to vector<1x256xf32>
    %51 = vector.broadcast %50 : vector<1x256xf32> to vector<8x256xf32>
    %52 = arith.mulf %49, %51 : vector<8x256xf32>
    %c15_i32_13 = arith.constant 15 : i32
    %53 = tpu.dynamic_rotate %43 by %c15_i32_13 dim 1 : vector<8x256xf32>, i32 -> vector<8x256xf32>
    %54 = vector.extract_strided_slice %2 {offsets = [2, 0], sizes = [1, 256], strides = [1, 1]} : vector<9x256xf32> to vector<1x256xf32>
    %55 = vector.broadcast %54 : vector<1x256xf32> to vector<8x256xf32>
    %56 = arith.mulf %53, %55 : vector<8x256xf32>
    %c1_i32_14 = arith.constant 1 : i32
    %57 = tpu.dynamic_rotate %43 by %c1_i32_14 dim 1 : vector<8x256xf32>, i32 -> vector<8x256xf32>
    %58 = vector.extract_strided_slice %2 {offsets = [3, 0], sizes = [1, 256], strides = [1, 1]} : vector<9x256xf32> to vector<1x256xf32>
    %59 = vector.broadcast %58 : vector<1x256xf32> to vector<8x256xf32>
    %60 = arith.mulf %57, %59 : vector<8x256xf32>
    %c255_i32_15 = arith.constant 255 : i32
    %61 = tpu.dynamic_rotate %43 by %c255_i32_15 dim 1 : vector<8x256xf32>, i32 -> vector<8x256xf32>
    %62 = vector.extract_strided_slice %2 {offsets = [5, 0], sizes = [1, 256], strides = [1, 1]} : vector<9x256xf32> to vector<1x256xf32>
    %63 = vector.broadcast %62 : vector<1x256xf32> to vector<8x256xf32>
    %64 = arith.mulf %61, %63 : vector<8x256xf32>
    %c241_i32_16 = arith.constant 241 : i32
    %65 = tpu.dynamic_rotate %43 by %c241_i32_16 dim 1 : vector<8x256xf32>, i32 -> vector<8x256xf32>
    %66 = vector.extract_strided_slice %2 {offsets = [6, 0], sizes = [1, 256], strides = [1, 1]} : vector<9x256xf32> to vector<1x256xf32>
    %67 = vector.broadcast %66 : vector<1x256xf32> to vector<8x256xf32>
    %68 = arith.mulf %65, %67 : vector<8x256xf32>
    %c240_i32_17 = arith.constant 240 : i32
    %69 = tpu.dynamic_rotate %43 by %c240_i32_17 dim 1 : vector<8x256xf32>, i32 -> vector<8x256xf32>
    %70 = vector.extract_strided_slice %2 {offsets = [7, 0], sizes = [1, 256], strides = [1, 1]} : vector<9x256xf32> to vector<1x256xf32>
    %71 = vector.broadcast %70 : vector<1x256xf32> to vector<8x256xf32>
    %72 = arith.mulf %69, %71 : vector<8x256xf32>
    %c239_i32_18 = arith.constant 239 : i32
    %73 = tpu.dynamic_rotate %43 by %c239_i32_18 dim 1 : vector<8x256xf32>, i32 -> vector<8x256xf32>
    %74 = vector.extract_strided_slice %2 {offsets = [8, 0], sizes = [1, 256], strides = [1, 1]} : vector<9x256xf32> to vector<1x256xf32>
    %75 = vector.broadcast %74 : vector<1x256xf32> to vector<8x256xf32>
    %76 = arith.mulf %73, %75 : vector<8x256xf32>
    %77 = tpu.concatenate %48, %52, %56, %60, %43, %64, %68, %72, %76 in 0 : vector<8x256xf32>, vector<8x256xf32>, vector<8x256xf32>, vector<8x256xf32>, vector<8x256xf32>, vector<8x256xf32>, vector<8x256xf32>, vector<8x256xf32>, vector<8x256xf32> -> vector<72x256xf32>
    %78 = arith.truncf %77 : vector<72x256xf32> to vector<72x256xbf16>
    %cst_19 = arith.constant dense<0.000000e+00> : vector<8x256xf32>
    %79 = tpu.matmul %44, %78, %cst_19 {dimension_numbers = #tpu.dot_dimension_numbers<[1], [0], [0], [1], [0, 0, 1, 1], [], []>} : vector<8x72xbf16>, vector<72x256xbf16>, vector<8x256xf32> -> vector<8x256xf32>
    %c0_20 = arith.constant 0 : index
    %c1 = arith.constant 1 : index
    %80 = vector.load %arg4[%c0_20, %c1] : memref<8x2xf32, #tpu.memory_space<vmem>>, vector<8x1xf32>
    %81 = vector.broadcast %80 : vector<8x1xf32> to vector<8x256xf32>
    %82 = arith.addf %79, %81 : vector<8x256xf32>
    %83 = arith.addf %82, %1 : vector<8x256xf32>
    %cst_21 = arith.constant 0.000000e+00 : f32
    %84 = vector.broadcast %cst_21 : f32 to vector<8x256xf32>
    %85 = arith.maximumf %83, %84 : vector<8x256xf32>
    %c0_22 = arith.constant 0 : index
    %c0_23 = arith.constant 0 : index
    %c0_24 = arith.constant 0 : index
    %86 = vector.load %arg6[%c0_22, %c0_23, %c0_24] : memref<1x8x256xf32, #tpu.memory_space<vmem>>, vector<1x8x256xf32>
    %87 = vector.shape_cast %86 : vector<1x8x256xf32> to vector<8x256xf32>
    %88 = vector.shape_cast %85 : vector<8x256xf32> to vector<1x8x256xf32>
    tpu.vector_store %arg6[%c0_22, %c0_23, %c0_24], %88 {strides = array<i32>} : memref<1x8x256xf32, #tpu.memory_space<vmem>>, vector<1x8x256xf32>,
    return
  }
  func.func @transform_0(%arg0: i32) -> (i32, i32, i32) {
    %c0_i32 = arith.constant 0 : i32
    %c0_i32_0 = arith.constant 0 : i32
    %c0_i32_1 = arith.constant 0 : i32
    return %arg0, %c0_i32, %c0_i32_0 : i32, i32, i32
  }
  func.func @transform_1(%arg0: i32) -> (i32, i32) {
    %c0_i32 = arith.constant 0 : i32
    %c0_i32_0 = arith.constant 0 : i32
    %c0_i32_1 = arith.constant 0 : i32
    return %c0_i32, %c0_i32_0 : i32, i32
  }
  func.func @transform_2(%arg0: i32) -> (i32, i32) {
    %c0_i32 = arith.constant 0 : i32
    %c0_i32_0 = arith.constant 0 : i32
    %c0_i32_1 = arith.constant 0 : i32
    return %c0_i32, %c0_i32_0 : i32, i32
  }
  func.func @transform_3(%arg0: i32) -> (i32, i32) {
    %c0_i32 = arith.constant 0 : i32
    %c0_i32_0 = arith.constant 0 : i32
    %c0_i32_1 = arith.constant 0 : i32
    return %c0_i32, %c0_i32_0 : i32, i32
  }
  func.func @transform_4(%arg0: i32) -> (i32, i32) {
    %c0_i32 = arith.constant 0 : i32
    %c0_i32_0 = arith.constant 0 : i32
    %c0_i32_1 = arith.constant 0 : i32
    return %c0_i32, %c0_i32_0 : i32, i32
  }
  func.func @transform_5(%arg0: i32) -> (i32, i32, i32) {
    %c0_i32 = arith.constant 0 : i32
    %c0_i32_0 = arith.constant 0 : i32
    %c0_i32_1 = arith.constant 0 : i32
    return %arg0, %c0_i32, %c0_i32_0 : i32, i32, i32
  }
}

</mosaic_0001>

<bundles_post_ra>
// kernel: basic_block_forward.1
= control target key start
LH: loop header
LB: loop body
LE: loop exit
PB: predicated region body
PF: predicated region fallthrough
CT: control target
= control target key end

     0   :  { %s718_s18 = smov 0   ;;  %s1005_s0 = inlined_call_operand.vmem [shape: f32[2,8,256], index: 0, kind: input, shape index: {}]   ;;  %s1006_s1 = inlined_call_operand.vmem [shape: bf16[8,72], index: 1, kind: input, shape index: {}]   ;;  %s1007_s2 = inlined_call_operand.vmem [shape: bf16[8,72], index: 2, kind: input, shape index: {}]   ;;  %s1008_s3 = inlined_call_operand.vmem [shape: f32[8,2], index: 3, kind: input, shape index: {}]   ;;  %s1009_s4 = inlined_call_operand.vmem [shape: f32[9,256], index: 4, kind: input, shape index: {}]   ;;  %s1010_s5 = inlined_call_operand.vmem [shape: f32[2,8,256], index: 5, kind: output, shape index: {}]  }
   0x1 LB: > { %s631_s19 = sadd.s32 4294967295, %s676_s18   ;;  %p635_p0 = scmp.ge.s32.totalorder %s676_s18, 1  ;;  %s676_s18 = sphi %s718_s18, %s15_s18  }
   0x2   : > { %p187_p1 = scmp.lt.s32.totalorder %s676_s18, 3 }
   0x4   : > { %p188_p2 = pnand %p635_p0, %p187_p1 }
   0x5   : > { %p215_p3 = scmp.lt.s32.totalorder (!%p188_p2), %s631_s19, 1  ;;  %s678_s24 = smov (!%p188_p2), 16   ;;  %v684_v2 = vmov (!%p188_p2), 0   ;;  %v773_v3 = vld [vmem:[%s1008_s3] sm:$0xff] (!%p188_p2)  ;;  %v237_v4 = vlaneseq (!%p188_p2)  ;;  %v790_v10 = vld [vmem:[%s1009_s4 + $0x8] sm:$0xff] (!%p188_p2)  ;;  %vm391_vm8 = vcmask (!%p188_p2), 1043456  }
   0x6   : > { %191 = sbr.rel (%p188_p2) target bundleno = 761 (0x2f9), region = 40  ;;  %s679_s25 = smov (!%p188_p2), 17   ;;  %430 = vmatprep.mubr.bf16.mxu0 (!%p188_p2), %v684_v2  ;;  %668 = vset.pattern.permute.xlu0 (!%p188_p2), %v684_v2  ;;  %v785_v9 = vld [vmem:[%s1009_s4] sm:$0xff] (!%p188_p2)  ;;  %vm387_vm9 = vcmask (!%p188_p2), 588800  }
   0x7   : > { %s680_s26 = smov (!%p188_p2), 15   ;;  %s681_s27 = smov (!%p188_p2), 1   ;;  %561 = vmatprep.mubr.bf16.mxu1 (!%p188_p2), %v684_v2  ;;  %v776_v5 = vshrl.u32 (!%p188_p2), %v237_v4, 7  ;;  %v778_v6 = vand.u32 (!%p188_p2), 127, %v237_v4 }
   0x8   : > { %s682_s28 = smov (!%p188_p2), 127   ;;  %s683_s29 = smov (!%p188_p2), 113  }
   0x9   : > { %s685_s30 = smov (!%p188_p2), 112   ;;  %s686_s6 = smov (!%p188_p2), 111   ;;  %v261_v7 = vsub.s32 (!%p188_p2), 1, %v776_v5  ;;  %v244_v8 = vsub.s32 (!%p188_p2), 0, %v776_v5  ;;  %vm256_vm0 = vcmp.lt.s32.totalorder (!%p188_p2), %v778_v6, 16  ;;  %vm239_vm1 = vcmp.lt.s32.totalorder (!%p188_p2), %v778_v6, 17 }
   0xa   : > { %v278_v19 = vsub.s32 (!%p188_p2), 2, %v776_v5  ;;  %v295_v20 = vsub.s32 (!%p188_p2), 3, %v776_v5  ;;  %vm273_vm2 = vcmp.lt.s32.totalorder (!%p188_p2), %v778_v6, 15  ;;  %vm290_vm3 = vcmp.lt.s32.totalorder (!%p188_p2), %v778_v6, 1 }
   0xb   : > { %v795_v13 = vrot.slane (!%p188_p2), %v785_v9, %v261_v7  ;;  %v798_v14 = vrot.slane (!%p188_p2), %v785_v9, %v244_v8  ;;  %v801_v15 = vrot.slane (!%p188_p2), %v790_v10, %v244_v8  ;;  %v804_v16 = vrot.slane (!%p188_p2), %v790_v10, %v261_v7 }
   0xc   : > { %v312_v33 = vsub.s32 (!%p188_p2), 5, %v776_v5  ;;  %v824_v34 = vrot.slane (!%p188_p2), %v785_v9, %v278_v19  ;;  %v827_v35 = vrot.slane (!%p188_p2), %v790_v10, %v278_v19  ;;  %v830_v36 = vrot.slane (!%p188_p2), %v785_v9, %v295_v20 }
   0xd   : > { %s1012_s19 = smov (!%p215_p3, %s631_s19), 1  ;;  %v833_v37 = vrot.slane %v790_v10, %v295_v20  ;;  %vm307_vm4 = vcmp.lt.s32.totalorder %v778_v6, 127  ;;  %v329_v56 = vsub.s32 6, %v776_v5  ;;  %v346_v59 = vsub.s32 7, %v776_v5 }
   0xe   : > { %s648_s20 = sshll.u32 %s1012_s19, 4  ;;  %v845_v44 = vrot.slane %v785_v9, %v312_v33  ;;  %v848_v45 = vrot.slane %v790_v10, %v312_v33  ;;  %vm324_vm5 = vcmp.lt.s32.totalorder %v778_v6, 113  ;;  %vm341_vm6 = vcmp.lt.s32.totalorder %v778_v6, 112 }
   0xf   : > { %s219_s23 = scalar_lea.vmem %s1005_s0, %s648_s20  ;;  %v866_v2 = vrot.slane %v785_v9, %v329_v56  ;;  %v869_v4 = vrot.slane %v790_v10, %v329_v56  ;;  %v873_v5 = vrot.slane %v785_v9, %v346_v59  ;;  %v876_v7 = vrot.slane %v790_v10, %v346_v59 }
  0x10   : > { %v734_v0 = vld [vmem:[%s219_s23] sm:$0xff]  ;;  %v740_v1 = vld [vmem:[%s219_s23 + $0x8] sm:$0xff]  ;;  %vm358_vm7 = vcmp.lt.s32.totalorder %v778_v6, 111 }
  0x11   : > { %252 = vrot.lane.b32.xlu1 %v734_v0, %s678_s24  ;;  %233 = vrot.lane.b32.xlu0 %v734_v0, %s679_s25 }
  0x15   : > { %254 = vrot.lane.b32.xlu1 %v740_v1, %s678_s24  ;;  %235 = vrot.lane.b32.xlu0 %v740_v1, %s679_s25 }
  0x19   : > { %271 = vrot.lane.b32.xlu1 %v740_v1, %s680_s26  ;;  %269 = vrot.lane.b32.xlu0 %v734_v0, %s680_s26 }
  0x1d   : > { %288 = vrot.lane.b32.xlu1 %v740_v1, %s681_s27  ;;  %286 = vrot.lane.b32.xlu0 %v734_v0, %s681_s27 }
  0x21   : > { %305 = vrot.lane.b32.xlu1 %v740_v1, %s682_s28  ;;  %303 = vrot.lane.b32.xlu0 %v734_v0, %s682_s28 }
  0x25   : > { %322 = vrot.lane.b32.xlu1 %v740_v1, %s683_s29  ;;  %320 = vrot.lane.b32.xlu0 %v734_v0, %s683_s29 }
  0x29   : > { %339 = vrot.lane.b32.xlu1 %v740_v1, %s685_s30  ;;  %337 = vrot.lane.b32.xlu0 %v734_v0, %s685_s30 }
  0x2d   : > { %356 = vrot.lane.b32.xlu1 %v740_v1, %s686_s6  ;;  %354 = vrot.lane.b32.xlu0 %v734_v0, %s686_s6 }
  0x31   : > { %384 = vperm.xlu0 %668, %v773_v3  }
  0x83   : > { %v253_v11 = vpop.permute.xlu1 %252  ;;  %v234_v12 = vpop.permute.xlu0 %233 }
  0x87   : > { %v255_v17 = vpop.permute.xlu1 %254  ;;  %v236_v18 = vpop.permute.xlu0 %235 }
  0x88   : > { %v257_v21 = vsel %vm256_vm0, %v253_v11, %v255_v17  ;;  %v258_v22 = vsel %vm256_vm0, %v255_v17, %v253_v11  ;;  %v240_v23 = vsel %vm239_vm1, %v234_v12, %v236_v18  ;;  %v241_v24 = vsel %vm239_vm1, %v236_v18, %v234_v12 }
  0x89   : > { %v267_v25 = vmul.f32 %v795_v13, %v258_v22  ;;  %v250_v26 = vmul.f32 %v798_v14, %v241_v24  ;;  %v251_v27 = vmul.f32 %v801_v15, %v240_v23  ;;  %v268_v28 = vmul.f32 %v804_v16, %v257_v21  ;;  %v894_v22 = vld [vmem:[%s1009_s4 + $0x10] ss:$0 sm:$0xff]  ;;  %v899_v23 = vld [vmem:[%s1009_s4 + $0x18] ss:$0 sm:$0xff] }
  0x8b   : > { %v272_v29 = vpop.permute.xlu1 %271  ;;  %v270_v30 = vpop.permute.xlu0 %269  ;;  %v372_v31 = vpack.c.bf16 %v268_v28, %v251_v27  ;;  %v371_v32 = vpack.c.bf16 %v267_v25, %v250_v26 }
  0x8c   : > { %v274_v38 = vsel %vm273_vm2, %v270_v30, %v272_v29  ;;  %v275_v39 = vsel %vm273_vm2, %v272_v29, %v270_v30 }
  0x8d   : > { %398 = vmatprep.subr.bf16.mxu0 %v372_v31  ;;  %v284_v46 = vmul.f32 %v824_v34, %v275_v39  ;;  %v285_v47 = vmul.f32 %v827_v35, %v274_v38  ;;  %v232_v39 = vld [vmem:[%s1006_s1] sm:$0xf] }
  0x8e   : > { %399 = vmatpush1.bf16.msra.mxu0 %v371_v32 }
  0x8f   : > { %v289_v40 = vpop.permute.xlu1 %288  ;;  %v287_v41 = vpop.permute.xlu0 %286 }
  0x90   : > { %v291_v42 = vsel %vm290_vm3, %v287_v41, %v289_v40  ;;  %v292_v43 = vsel %vm290_vm3, %v289_v40, %v287_v41 }
  0x91   : > { %v301_v48 = vmul.f32 %v830_v36, %v292_v43  ;;  %v302_v49 = vmul.f32 %v833_v37, %v291_v42 }
  0x93   : > { %v306_v50 = vpop.permute.xlu1 %305  ;;  %v304_v51 = vpop.permute.xlu0 %303  ;;  %v374_v52 = vpack.c.bf16 %v302_v49, %v285_v47  ;;  %v373_v53 = vpack.c.bf16 %v301_v48, %v284_v46 }
  0x94   : > { %v308_v54 = vsel %vm307_vm4, %v304_v51, %v306_v50  ;;  %v309_v55 = vsel %vm307_vm4, %v306_v50, %v304_v51  ;;  %v687_v51 = vmov 1  }
  0x95   : > { %v318_v57 = vmul.f32 %v845_v44, %v308_v54  ;;  %v319_v58 = vmul.f32 %v848_v45, %v309_v55  ;;  %400 = vmatprep.subr.bf16.mxu0 %v374_v52  ;;  %669 = vset.pattern.permute.xlu0 %v687_v51 }
  0x96   : > { %401 = vmatpush1.bf16.msra.mxu0 %v373_v53 }
  0x97   : > { %v323_v60 = vpop.permute.xlu1 %322  ;;  %v321_v61 = vpop.permute.xlu0 %320  ;;  %v376_v62 = vpack.c.bf16 %v319_v58, %v740_v1  ;;  %v375_v63 = vpack.c.bf16 %v318_v57, %v734_v0 }
  0x98   : > { %v325_v8 = vsel %vm324_vm5, %v321_v61, %v323_v60  ;;  %v326_v11 = vsel %vm324_vm5, %v323_v60, %v321_v61 }
  0x99   : > { %402 = vmatprep.subr.bf16.mxu0 %v376_v62  ;;  %v335_v9 = vmul.f32 %v866_v2, %v325_v8  ;;  %v336_v10 = vmul.f32 %v869_v4, %v326_v11 }
  0x9a   : > { %403 = vmatpush1.bf16.msra.mxu0 %v375_v63 }
  0x9b   : > { %v340_v12 = vpop.permute.xlu1 %339  ;;  %v338_v17 = vpop.permute.xlu0 %337 }
  0x9c   : > { %v342_v18 = vsel %vm341_vm6, %v338_v17, %v340_v12  ;;  %v343_v19 = vsel %vm341_vm6, %v340_v12, %v338_v17 }
  0x9d   : > { %v352_v20 = vmul.f32 %v873_v5, %v342_v18  ;;  %v353_v21 = vmul.f32 %v876_v7, %v343_v19 }
  0x9f   : > { %v357_v24 = vpop.permute.xlu1 %356  ;;  %v355_v25 = vpop.permute.xlu0 %354  ;;  %v378_v26 = vpack.c.bf16 %v353_v21, %v336_v10  ;;  %v377_v27 = vpack.c.bf16 %v352_v20, %v335_v9 }
  0xa0   : > { %v359_v28 = vsel %vm358_vm7, %v355_v25, %v357_v24  ;;  %v360_v29 = vsel %vm358_vm7, %v357_v24, %v355_v25 }
  0xa1   : > { %v369_v30 = vmul.f32 %v894_v22, %v359_v28  ;;  %v370_v31 = vmul.f32 %v899_v23, %v360_v29  ;;  %404 = vmatprep.subr.bf16.mxu0 %v378_v26 }
  0xa2   : > { %405 = vmatpush1.bf16.msra.mxu0 %v377_v27 }
  0xa3   : > { %v379_v32 = vpack.c.bf16 %v369_v30, %v369_v30  ;;  %v380_v33 = vpack.c.bf16 %v370_v31, %v370_v31 }
  0xa5   : > { %642 = vmatprep.subr.msk.bf16.mxu0 %vm391_vm8, %v380_v33  ;;  %v393_v38 = vsel %vm391_vm8, %v379_v32, 0 }
  0xa6   : > { %407 = vmatpush1.bf16.msra.mxu0 %v393_v38 }
  0xa9   : > { %643 = vmatmul.mubr.msk.bf16.vlgmr.msra.gmra.mrb[0].mxu0 %vm387_vm9, %v232_v39 }
  0xb0   : > { %v385_v40 = vpop.permute.xlu0 %384 }
 0x17c   : > { %v432_v41 = vpop.f32.mrb[0].mxu0 }
 0x17d   : > { %v433_v42 = vadd.f32 %v432_v41, %v385_v40  ;;  %v434_v43 = vpop.f32.mrb[1].mxu0 }
 0x17e   : > { %v436_v46 = vpop.f32.mrb[2].mxu0  ;;  %v435_v48 = vadd.f32 %v434_v43, %v385_v40 }
 0x17f   : > { %v913_v47 = vmax.f32 %v433_v42, 0.0  ;;  %v437_v49 = vpop.f32.mrb[3].mxu0 }
 0x180   : > { %v440_v50 = vmax.f32 %v435_v48, 0.0 }
 0x181   : > { %450 = vrot.lane.b32.xlu0 %v913_v47, %s678_s24  ;;  %442 = vrot.lane.b32.xlu1 %v913_v47, %s679_s25 }
 0x185   : > { %458 = vrot.lane.b32.xlu0 %v913_v47, %s680_s26  ;;  %444 = vrot.lane.b32.xlu1 %v440_v50, %s679_s25 }
 0x189   : > { %466 = vrot.lane.b32.xlu0 %v913_v47, %s681_s27  ;;  %452 = vrot.lane.b32.xlu1 %v440_v50, %s678_s24 }
 0x18d   : > { %474 = vrot.lane.b32.xlu0 %v913_v47, %s682_s28  ;;  %460 = vrot.lane.b32.xlu1 %v440_v50, %s680_s26  ;;  %s224_s26 = scalar_lea.vmem %s1010_s5, %s648_s20 }
 0x191   : > { %482 = vrot.lane.b32.xlu0 %v913_v47, %s683_s29  ;;  %468 = vrot.lane.b32.xlu1 %v440_v50, %s681_s27 }
 0x195   : > { %490 = vrot.lane.b32.xlu0 %v913_v47, %s685_s30  ;;  %476 = vrot.lane.b32.xlu1 %v440_v50, %s682_s28 }
 0x199   : > { %498 = vrot.lane.b32.xlu0 %v913_v47, %s686_s6  ;;  %484 = vrot.lane.b32.xlu1 %v440_v50, %s683_s29 }
 0x19d   : > { %492 = vrot.lane.b32.xlu1 %v440_v50, %s685_s30  ;;  %517 = vperm.xlu0 %669, %v773_v3  }
 0x1a1   : > { %500 = vrot.lane.b32.xlu1 %v440_v50, %s686_s6 }
 0x1f3   : > { %v451_v52 = vpop.permute.xlu0 %450  ;;  %v443_v53 = vpop.permute.xlu1 %442 }
 0x1f7   : > { %v459_v54 = vpop.permute.xlu0 %458  ;;  %v445_v55 = vpop.permute.xlu1 %444 }
 0x1f8   : > { %v446_v56 = vsel %vm239_vm1, %v443_v53, %v445_v55  ;;  %v447_v57 = vsel %vm239_vm1, %v445_v55, %v443_v53 }
 0x1f9   : > { %v448_v61 = vmul.f32 %v447_v57, %v798_v14  ;;  %v449_v63 = vmul.f32 %v446_v56, %v801_v15 }
 0x1fb   : > { %v467_v58 = vpop.permute.xlu0 %466  ;;  %v453_v59 = vpop.permute.xlu1 %452 }
 0x1fc   : > { %v454_v60 = vsel %vm256_vm0, %v451_v52, %v453_v59  ;;  %v455_v3 = vsel %vm256_vm0, %v453_v59, %v451_v52  ;;  %v441_v52 = vld [vmem:[%s1007_s2] sm:$0xf] }
 0x1fd   : > { %v456_v62 = vmul.f32 %v455_v3, %v795_v13  ;;  %v457_v8 = vmul.f32 %v454_v60, %v804_v16 }
 0x1ff   : > { %v461_v11 = vpop.permute.xlu1 %460  ;;  %v507_v12 = vpack.c.bf16 %v457_v8, %v449_v63  ;;  %v506_v17 = vpack.c.bf16 %v456_v62, %v448_v61  ;;  %v475_v18 = vpop.permute.xlu0 %474 }
 0x200   : > { %v462_v19 = vsel %vm273_vm2, %v459_v54, %v461_v11  ;;  %v463_v9 = vsel %vm273_vm2, %v461_v11, %v459_v54 }
 0x201   : > { %529 = vmatprep.subr.bf16.mxu1 %v507_v12  ;;  %v464_v15 = vmul.f32 %v463_v9, %v824_v34  ;;  %v465_v16 = vmul.f32 %v462_v19, %v827_v35 }
 0x202   : > { %530 = vmatpush1.bf16.msra.mxu1 %v506_v17 }
 0x203   : > { %v469_v10 = vpop.permute.xlu1 %468  ;;  %v483_v24 = vpop.permute.xlu0 %482 }
 0x204   : > { %v470_v13 = vsel %vm290_vm3, %v467_v58, %v469_v10  ;;  %v471_v14 = vsel %vm290_vm3, %v469_v10, %v467_v58 }
 0x205   : > { %v472_v20 = vmul.f32 %v471_v14, %v830_v36  ;;  %v473_v21 = vmul.f32 %v470_v13, %v833_v37 }
 0x207   : > { %v477_v25 = vpop.permute.xlu1 %476  ;;  %v509_v26 = vpack.c.bf16 %v473_v21, %v465_v16  ;;  %v508_v27 = vpack.c.bf16 %v472_v20, %v464_v15  ;;  %v491_v31 = vpop.permute.xlu0 %490 }
 0x208   : > { %v478_v28 = vsel %vm307_vm4, %v475_v18, %v477_v25  ;;  %v479_v29 = vsel %vm307_vm4, %v477_v25, %v475_v18 }
 0x209   : > { %v480_v30 = vmul.f32 %v478_v28, %v845_v44  ;;  %v481_v34 = vmul.f32 %v479_v29, %v848_v45  ;;  %531 = vmatprep.subr.bf16.mxu1 %v509_v26 }
 0x20a   : > { %532 = vmatpush1.bf16.msra.mxu1 %v508_v27 }
 0x20b   : > { %v485_v35 = vpop.permute.xlu1 %484  ;;  %v511_v36 = vpack.c.bf16 %v481_v34, %v440_v50  ;;  %v510_v37 = vpack.c.bf16 %v480_v30, %v913_v47  ;;  %v499_v43 = vpop.permute.xlu0 %498 }
 0x20c   : > { %v486_v32 = vsel %vm324_vm5, %v483_v24, %v485_v35  ;;  %v487_v33 = vsel %vm324_vm5, %v485_v35, %v483_v24 }
 0x20d   : > { %533 = vmatprep.subr.bf16.mxu1 %v511_v36  ;;  %v488_v39 = vmul.f32 %v486_v32, %v866_v2  ;;  %v489_v40 = vmul.f32 %v487_v33, %v869_v4 }
 0x20e   : > { %534 = vmatpush1.bf16.msra.mxu1 %v510_v37 }
 0x20f   : > { %v493_v38 = vpop.permute.xlu1 %492 }
 0x210   : > { %v494_v44 = vsel %vm341_vm6, %v491_v31, %v493_v38  ;;  %v495_v45 = vsel %vm341_vm6, %v493_v38, %v491_v31 }
 0x211   : > { %v496_v41 = vmul.f32 %v494_v44, %v873_v5  ;;  %v497_v42 = vmul.f32 %v495_v45, %v876_v7 }
 0x213   : > { %v501_v46 = vpop.permute.xlu1 %500  ;;  %v513_v47 = vpack.c.bf16 %v497_v42, %v489_v40  ;;  %v512_v48 = vpack.c.bf16 %v496_v41, %v488_v39 }
 0x214   : > { %v502_v49 = vsel %vm358_vm7, %v499_v43, %v501_v46  ;;  %v503_v50 = vsel %vm358_vm7, %v501_v46, %v499_v43 }
 0x215   : > { %v504_v51 = vmul.f32 %v894_v22, %v502_v49  ;;  %v505_v2 = vmul.f32 %v899_v23, %v503_v50  ;;  %535 = vmatprep.subr.bf16.mxu1 %v513_v47 }
 0x216   : > { %536 = vmatpush1.bf16.msra.mxu1 %v512_v48 }
 0x217   : > { %v514_v4 = vpack.c.bf16 %v504_v51, %v504_v51  ;;  %v515_v5 = vpack.c.bf16 %v505_v2, %v505_v2 }
 0x219   : > { %644 = vmatprep.subr.msk.bf16.mxu1 %vm391_vm8, %v515_v5  ;;  %v524_v7 = vsel %vm391_vm8, %v514_v4, 0 }
 0x21a   : > { %538 = vmatpush1.bf16.msra.mxu1 %v524_v7 }
 0x21c   : > { %v518_v6 = vpop.permute.xlu0 %517 }
 0x21d   : > { %645 = vmatmul.mubr.msk.bf16.vlgmr.msra.gmra.mrb[0].mxu1 %vm387_vm9, %v441_v52 }
 0x2f0   : > { %v563_v22 = vpop.f32.mrb[0].mxu1 }
 0x2f1   : > { %v564_v53 = vadd.f32 %v563_v22, %v518_v6  ;;  %v565_v23 = vpop.f32.mrb[1].mxu1 }
 0x2f2   : > { %v566_v54 = vadd.f32 %v565_v23, %v518_v6  ;;  %v567_v55 = vpop.f32.mrb[2].mxu1 }
 0x2f3   : > { %v570_v56 = vadd.f32 %v564_v53, %v734_v0  ;;  %v568_v57 = vpop.f32.mrb[3].mxu1 }
 0x2f4   : > { %v571_v58 = vadd.f32 %v566_v54, %v740_v1 }
 0x2f5   : > { %v572_v59 = vmax.f32 %v570_v56, 0.0 }
 0x2f6   : > { %v573_v60 = vmax.f32 %v571_v58, 0.0 }
 0x2f7   : > { %574 = vst [vmem:[%s224_s26] sm:$0xff] %v572_v59 }
 0x2f8   : > { %575 = vst [vmem:[%s224_s26 + $0x8] sm:$0xff] %v573_v60 }
 0x2f9 PF: > { %s15_s18 = sadd.s32 1, %s676_s18  }
 0x2fa   : > { %p12_p4 = scmp.ge.s32.totalorder %s15_s18, 4  }
 0x2fc   :  { %14 = sbr.rel (!%p12_p4) target bundleno = 1 (0x1), region = 70 }

</bundles_post_ra>
